<compile_context>
chip_gen: v5e
topology: v5e:2x2
jax: 0.10.0
libtpu: 0.0.40
codegen_flags: <defaults>
</compile_context>

<pallas_src>
import math

import jax
import jax.numpy as jnp
from jax.experimental import pallas as pl
from jax.experimental.pallas import tpu as pltpu


def _copy_kernel(x_ref, o_ref):
    # Pure identity: `view` never changes the data.
    o_ref[...] = x_ref[...]


def _sublane_multiple(dtype):
    itemsize = jnp.dtype(dtype).itemsize
    return {4: 8, 2: 16, 1: 32}.get(itemsize, 8)


# ~1 MiB blocks: (in + out) x double-buffering = ~4 MiB of VMEM, well inside
# every generation's scoped VMEM, yet large enough (>= 85% of HBM roofline).
_BLOCK_TARGET_BYTES = 1 << 20


def _pick_block_rows(rows, cols, itemsize, sublane):
    """Largest multiple of `sublane` that divides `rows` and keeps the block
    at or under ~_BLOCK_TARGET_BYTES.  Returns None if no such divisor."""
    if rows % sublane != 0:
        return None
    limit = max(sublane, _BLOCK_TARGET_BYTES // (cols * itemsize))
    limit = min(limit, rows)
    best = None
    for d in range(sublane, limit + 1, sublane):
        if rows % d == 0:
            best = d
    return best


def _pallas_copy_2d(buf):
    """Identity-copy a lane-dense (rows, cols) buffer through VMEM."""
    rows, cols = buf.shape
    itemsize = jnp.dtype(buf.dtype).itemsize
    sublane = _sublane_multiple(buf.dtype)

    block_rows = _pick_block_rows(rows, cols, itemsize, sublane)
    if block_rows is None:
        # Awkward row count (e.g. rows < sublane): a single block covering the
        # full array extent is always a legal block shape.
        block_rows = rows
    grid = (rows // block_rows,)

    return pl.pallas_call(
        _copy_kernel,
        out_shape=jax.ShapeDtypeStruct((rows, cols), buf.dtype),
        grid=grid,
        in_specs=[pl.BlockSpec((block_rows, cols), lambda i: (i, 0))],
        out_specs=pl.BlockSpec((block_rows, cols), lambda i: (i, 0)),
        compiler_params=pltpu.CompilerParams(
            dimension_semantics=("parallel",)),
    )(buf)


def _pallas_copy_flat_padded(flat):
    """Fallback for element counts not divisible by 128: one pad + one slice."""
    n = flat.shape[0]
    sublane = _sublane_multiple(flat.dtype)
    cols = 512
    chunk = sublane * cols
    padded_n = ((n + chunk - 1) // chunk) * chunk
    buf = jnp.pad(flat, (0, padded_n - n)).reshape(padded_n // cols, cols)
    return _pallas_copy_2d(buf).reshape(-1)[:n]


def reshape_forward(x, shape):
    """Pallas-backed equivalent of torch `x.view(shape)` (row-major)."""
    # Resolve a single -1 in the target shape, like torch .view does.
    shape = list(shape)
    total = math.prod(x.shape)
    if -1 in shape:
        idx = shape.index(-1)
        known = math.prod(s for i, s in enumerate(shape) if i != idx)
        shape[idx] = total // known
    shape = tuple(int(s) for s in shape)
    assert math.prod(shape) == total, "view shape mismatch"

    # NOTE: for a contiguous input this whole op is metadata-only; the Pallas
    # copy below exists so the forward pass runs through a TPU kernel.
    flat = x.reshape(-1)          # metadata-only reshape in XLA
    n = flat.shape[0]

    # Widest lane-dense factorization that requires NO padding.
    cols = next((c for c in (4096, 2048, 1024, 512, 256, 128) if n % c == 0),
                None)
    if cols is not None:
        out_flat = _pallas_copy_2d(flat.reshape(n // cols, cols)).reshape(-1)
    else:
        out_flat = _pallas_copy_flat_padded(flat)

    return out_flat.reshape(shape)


class Reshape:
    """Mirror of the PyTorch module: Reshape(*shape)."""

    def __init__(self, *args):
        self.shape = args

    def __call__(self, x):
        return reshape_forward(x, self.shape)


if __name__ == "__main__":
    key = jax.random.PRNGKey(0)

    # Small NCHW input consistent with the synthetic module usage.
    x = jax.random.normal(key, (2, 4, 16, 16), dtype=jnp.float32)
    module = Reshape(2, -1)                      # -> (2, 1024)
    y = jax.block_until_ready(module(x))
    ref = x.reshape(2, -1)
    assert y.shape == (2, 4 * 16 * 16)
    assert y.dtype == x.dtype
    assert bool(jnp.array_equal(y, ref))

    # bf16 path (dtype-aware sublane multiple).
    xb = x.astype(jnp.bfloat16)
    yb = jax.block_until_ready(Reshape(8, -1)(xb))
    assert bool(jnp.array_equal(yb, xb.reshape(8, -1)))

    # Odd size that is not a multiple of 128 (exercises the padded fallback).
    xo = jax.random.normal(key, (3, 5, 7), dtype=jnp.float32)
    yo = jax.block_until_ready(Reshape(-1,)(xo))
    assert bool(jnp.array_equal(yo, xo.reshape(-1)))

    print("KERNEL_OK")
</pallas_src>

<mosaic_0001>
module attributes {stable_mosaic.version = 11 : i64} {
  func.func @_copy_kernel(%arg0: i32, %arg1: memref<1x2048xf32, #tpu.memory_space<vmem>>, %arg2: memref<1x2048xf32, #tpu.memory_space<vmem>>) attributes {dimension_semantics = [#tpu.dimension_semantics<parallel>], iteration_bounds = array<i64: 1>, scalar_prefetch = 0 : i64, scratch_operands = 0 : i64, tpu.core_type = #tpu.core_type<tc>, window_params = [{transform_indices = @transform_0, window_bounds = array<i64: 1, 2048>}, {transform_indices = @transform_1, window_bounds = array<i64: 1, 2048>}]} {
    %c0 = arith.constant 0 : index
    %c0_0 = arith.constant 0 : index
    %0 = vector.load %arg1[%c0, %c0_0] : memref<1x2048xf32, #tpu.memory_space<vmem>>, vector<1x2048xf32>
    %c0_1 = arith.constant 0 : index
    %c0_2 = arith.constant 0 : index
    %1 = vector.load %arg2[%c0_1, %c0_2] : memref<1x2048xf32, #tpu.memory_space<vmem>>, vector<1x2048xf32>
    tpu.vector_store %arg2[%c0_1, %c0_2], %0 {strides = array<i32>} : memref<1x2048xf32, #tpu.memory_space<vmem>>, vector<1x2048xf32>,
    return
  }
  func.func @transform_0(%arg0: i32) -> (i32, i32) {
    %c0_i32 = arith.constant 0 : i32
    %c0_i32_0 = arith.constant 0 : i32
    return %arg0, %c0_i32 : i32, i32
  }
  func.func @transform_1(%arg0: i32) -> (i32, i32) {
    %c0_i32 = arith.constant 0 : i32
    %c0_i32_0 = arith.constant 0 : i32
    return %arg0, %c0_i32 : i32, i32
  }
}

</mosaic_0001>

<bundles_post_ra>
// kernel: tpu_custom_call.1
= control target key start
LH: loop header
LB: loop body
LE: loop exit
PB: predicated region body
PF: predicated region fallthrough
CT: control target
= control target key end

     0   :  { %6 = vsyncpa [#allocation3], 0  ;;  %s116_s0 = inlined_call_operand.hbm [shape: f32[1,2048], index: 0, kind: input, shape index: {}]   ;;  %s117_s1 = inlined_call_operand.hbm [shape: f32[1,2048], index: 1, kind: output, shape index: {}]  }
   0x1   :  { %7 = vsyncpa [#allocation4], 0  ;;  %s13_s8 = sshll.u32 %s116_s0, 4  ;;  %s98_s9 = smov [#allocation2]   ;;  %s14_s8 = int_to_ptr.hbm [resolvable:$true] %s13_s8 }
   0x2   :  { %s15_s10 = sshll.u32 %s98_s9, 4  ;;  %s16_s10 = int_to_ptr.vmem [resolvable:$true] %s15_s10 }
   0x3   :  { %18 = dma.hbm_to_vmem [thread:$0]  %s14_s8, 256, %s16_s10, [#allocation3]  }
   0x4   :  { %94 = dma.done.wait [#allocation3], 256  }
   0x5   :  { %95 = vsyncadd [#allocation3], 4294967040  ;;  %s99_s11 = smov [#allocation5]   ;;  %s34_s15 = sshll.u32 %s117_s1, 4  ;;  %v23_v0 = vld [vmem:[#allocation2] sm:$0xff]  ;;  %v24_v1 = vld [vmem:[#allocation2 + $0x8] sm:$0xff]  ;;  %s35_s15 = int_to_ptr.hbm [resolvable:$true] %s34_s15 }
   0x6   :  { %s32_s12 = sshll.u32 %s99_s11, 4  ;;  %25 = vst [vmem:[#allocation5] sm:$0xff] %v23_v0  ;;  %s33_s12 = int_to_ptr.vmem [resolvable:$true] %s32_s12 }
   0x7   :  { %26 = vst [vmem:[#allocation5 + $0x8] sm:$0xff] %v24_v1 }
   0x8   :  { %37 = dma.vmem_to_hbm [thread:$0]  %s33_s12, 256, %s35_s15, [#allocation4]  }
   0x9   :  { %96 = dma.done.wait [#allocation4], 256  }
   0xa   :  { %97 = vsyncadd [#allocation4], 4294967040 }
   0xb   :  { %42 = vsyncpa [#allocation3], 1 }
   0xc   :  { %43 = vsyncpa [#allocation4], 1 }

</bundles_post_ra>
